<compile_context>
chip_gen: v7x
topology: tpu7x:2x2x1
jax: 0.10.0
libtpu: 0.0.40
codegen_flags: <defaults>
</compile_context>

<pallas_src>
import functools

import jax
import jax.numpy as jnp
from jax.experimental import pallas as pl
from jax.experimental.pallas import tpu as pltpu


def _round_up(v: int, m: int) -> int:
    return ((v + m - 1) // m) * m


def _gcn_agg_kernel(a_ref, xw_ref, b_ref, o_ref, deg_ref, *, tk, xw_resident):
    """acc += A_blk @ XW_blk; deg += rowsum(A_blk); epilogue: *d_in^-1/2 + b, ReLU."""
    k = pl.program_id(2)

    @pl.when(k == 0)
    def _init():
        o_ref[...] = jnp.zeros_like(o_ref)
        deg_ref[...] = jnp.zeros_like(deg_ref)

    # int8 (0/1) adjacency tile -> f32 (for the exact degree row-sum) and bf16 (MXU).
    a_f32 = a_ref[...].astype(jnp.float32)
    a_bf16 = a_f32.astype(jnp.bfloat16)

    if xw_resident:
        # Full XW lives in VMEM; slice the rows of this src block.
        start = pl.multiple_of(k * tk, tk)
        xw = xw_ref[pl.ds(start, tk), :]
    else:
        xw = xw_ref[...]

    # Single MXU dot per step, f32 accumulation directly into the resident output block.
    o_ref[...] += jnp.dot(a_bf16, xw, preferred_element_type=jnp.float32)

    # In-degree partial row-sums ride on XLU/VPU slots while the MXU works.
    deg_ref[...] += jnp.sum(a_f32, axis=-1, keepdims=True)

    # Epilogue only once per (i, j) output tile, on the last reduction step.
    @pl.when(k == pl.num_programs(2) - 1)
    def _epilogue():
        din = jax.lax.rsqrt(jnp.maximum(deg_ref[...], 1.0))  # clamp(min=1) then ^-1/2
        o_ref[...] = jnp.maximum(o_ref[...] * din + b_ref[...], 0.0).astype(o_ref.dtype)


@functools.partial(jax.jit, static_argnames=("tm", "tk"))
def gcn_block_forward(adj, x, weight, bias, *, tm=512, tk=512):
    """GCNBlock forward: ReLU(D_in^-1/2 (A @ ((x D_out^-1/2) @ W)) + b).

    adj:    (N_dst, N_src) dense 0/1 adjacency (A[i, j] = edge j -> i)
    x:      (N_src, C_in)  node features
    weight: (C_in, C_out)  GraphConv weight
    bias:   (C_out,)       GraphConv bias
    """
    n_dst, n_src = adj.shape
    c_in = x.shape[1]
    c_out = weight.shape[1]

    # ---------------- static tile selection ----------------
    nd128 = _round_up(n_dst, 128)
    ns128 = _round_up(n_src, 128)
    tm = min(tm, nd128)
    tk = min(tk, ns128)
    # v7x has 2 TensorCores sharded over the parallel grid axes: keep >= 2 dst tiles.
    if nd128 // tm < 2 and nd128 >= 256:
        tm = max(128, _round_up(nd128 // 2, 128))
    nd_pad = _round_up(n_dst, tm)
    ns_pad = _round_up(n_src, tk)

    co_full = _round_up(c_out, 128)
    BUDGET = 40 * 1024 * 1024  # v7x-safe VMEM target (64 MiB/TC total there)
    tn = 128
    for cand in (co_full, 512, 256, 128):
        if cand % 128 != 0:
            continue
        co_cand = _round_up(c_out, cand)
        if co_cand > co_full:  # would over-pad the output (e.g. c_out=300 with tn=256)
            continue
        est = (2 * tm * tk                 # double-buffered int8 A tiles
               + 2 * tm * cand * 4         # f32 output/accumulator block
               + 2 * 2 * tk * cand         # double-buffered bf16 XW tiles
               + 2 * cand * 4 + tm * 4)    # bias + degree scratch
        if est <= BUDGET:
            tn = cand
            break
    co_pad = _round_up(c_out, tn)
    grid_j = co_pad // tn

    # Keep the whole projected XW VMEM-resident (loaded once) when it is small.
    xw_resident = (grid_j == 1) and (
        ns_pad * co_pad * 2
        + 2 * tm * tk + 2 * tm * co_pad * 4 + 2 * co_pad * 4 + tm * 4
        <= BUDGET)

    # ---------------- wrapper-side prep (O(N^2) int8 pass + tiny matmul) ----------------
    # int8 0/1 adjacency in HBM (halves the dominant stream vs bf16, quarters vs f32).
    a_p = jnp.zeros((nd_pad, ns_pad), jnp.int8)
    a_p = a_p.at[:n_dst, :n_src].set(adj.astype(jnp.int8))

    # Source out-degrees = column sums (f32 accumulation, exact for 0/1).
    deg_out = jnp.sum(a_p, axis=0, dtype=jnp.float32)            # (ns_pad,)
    dout_rsqrt = jax.lax.rsqrt(jnp.maximum(deg_out, 1.0))

    # Hoisted projection XW = (x * d_out^-1/2) @ W, computed once in f32, cast to bf16.
    x_p = jnp.zeros((ns_pad, c_in), jnp.float32)
    x_p = x_p.at[:n_src, :].set(x.astype(jnp.float32))
    xw = (x_p * dout_rsqrt[:, None]) @ weight.astype(jnp.float32)  # (ns_pad, c_out)
    xw_p = jnp.zeros((ns_pad, co_pad), jnp.bfloat16)
    xw_p = xw_p.at[:, :c_out].set(xw.astype(jnp.bfloat16))

    b_p = jnp.zeros((1, co_pad), jnp.float32)
    b_p = b_p.at[0, :c_out].set(bias.astype(jnp.float32))

    # ---------------- fused aggregation kernel ----------------
    grid = (nd_pad // tm, grid_j, ns_pad // tk)

    if xw_resident:
        xw_spec = pl.BlockSpec((ns_pad, co_pad), lambda i, j, k: (0, 0))
    else:
        xw_spec = pl.BlockSpec((tk, tn), lambda i, j, k: (k, j))

    kernel = functools.partial(_gcn_agg_kernel, tk=tk, xw_resident=xw_resident)

    out_pad = pl.pallas_call(
        kernel,
        out_shape=jax.ShapeDtypeStruct((nd_pad, co_pad), jnp.float32),
        grid_spec=pltpu.PrefetchScalarGridSpec(
            num_scalar_prefetch=0,
            grid=grid,
            in_specs=[
                pl.BlockSpec((tm, tk), lambda i, j, k: (i, k)),   # A tile (int8)
                xw_spec,                                          # projected features
                pl.BlockSpec((1, tn), lambda i, j, k: (0, j)),    # bias
            ],
            out_specs=pl.BlockSpec((tm, tn), lambda i, j, k: (i, j)),
            scratch_shapes=[pltpu.VMEM((tm, 1), jnp.float32)],    # in-degree accumulator
        ),
        compiler_params=pltpu.CompilerParams(
            dimension_semantics=("parallel", "parallel", "arbitrary"),
            vmem_limit_bytes=48 * 1024 * 1024,
        ),
    )(a_p, xw_p, b_p)

    return out_pad[:n_dst, :c_out]


def gcn_reference(adj, x, weight, bias):
    """Pure-JAX f32 reference with identical semantics."""
    a = adj.astype(jnp.float32)
    deg_out = jnp.maximum(jnp.sum(a, axis=0), 1.0)
    deg_in = jnp.maximum(jnp.sum(a, axis=1), 1.0)
    h = x * jax.lax.rsqrt(deg_out)[:, None]
    h = a @ h
    h = h @ weight
    h = h * jax.lax.rsqrt(deg_in)[:, None] + bias[None, :]
    return jnp.maximum(h, 0.0)


if __name__ == "__main__":
    key = jax.random.PRNGKey(0)
    k_adj, k_x, k_w, k_b = jax.random.split(key, 4)

    # Small GCN layer: 200 nodes, in_dim=96 -> hid_dim=48.
    n_nodes, in_dim, hid_dim = 200, 96, 48
    adj = jax.random.bernoulli(k_adj, 0.1, (n_nodes, n_nodes)).astype(jnp.float32)
    x = jax.random.normal(k_x, (n_nodes, in_dim), jnp.float32)
    weight = jax.random.normal(k_w, (in_dim, hid_dim), jnp.float32) / jnp.sqrt(float(in_dim))
    bias = 0.1 * jax.random.normal(k_b, (hid_dim,), jnp.float32)

    out = gcn_block_forward(adj, x, weight, bias)
    out = jax.block_until_ready(out)

    ref = gcn_reference(adj, x, weight, bias)
    assert out.shape == (n_nodes, hid_dim), out.shape
    if not jnp.allclose(out, ref, rtol=5e-2, atol=5e-2):
        max_err = float(jnp.max(jnp.abs(out - ref)))
        raise AssertionError(f"kernel/reference mismatch, max abs err = {max_err}")

    print("KERNEL_OK")
</pallas_src>

<mosaic_0001>
module attributes {stable_mosaic.version = 11 : i64} {
  func.func @_gcn_agg_kernel(%arg0: i32, %arg1: i32, %arg2: i32, %arg3: memref<128x256xi8, #tpu.memory_space<vmem>>, %arg4: memref<256x128xbf16, #tpu.memory_space<vmem>>, %arg5: memref<1x128xf32, #tpu.memory_space<vmem>>, %arg6: memref<128x128xf32, #tpu.memory_space<vmem>>, %arg7: memref<128x1xf32, #tpu.memory_space<vmem>>) attributes {dimension_semantics = [#tpu.dimension_semantics<parallel>, #tpu.dimension_semantics<parallel>, #tpu.dimension_semantics<arbitrary>], iteration_bounds = array<i64: 2, 1, 1>, scalar_prefetch = 0 : i64, scratch_operands = 1 : i64, tpu.core_type = #tpu.core_type<tc>, window_params = [{transform_indices = @transform_0, window_bounds = array<i64: 128, 256>}, {pipeline_mode = #tpu.pipeline_mode<synchronous>, transform_indices = @transform_1, window_bounds = array<i64: 256, 128>}, {transform_indices = @transform_2, window_bounds = array<i64: 1, 128>}, {transform_indices = @transform_3, window_bounds = array<i64: 128, 128>}]} {
    %c0_i32 = arith.constant 0 : i32
    %0 = arith.cmpi eq, %arg2, %c0_i32 : i32
    %1 = arith.extui %0 : i1 to i32
    %c0_i32_0 = arith.constant 0 : i32
    %2 = arith.cmpi ne, %1, %c0_i32_0 : i32
    scf.if %2 {
      %cst_14 = arith.constant 0.000000e+00 : f32
      %22 = vector.broadcast %cst_14 : f32 to vector<128x128xf32>
      %c0_15 = arith.constant 0 : index
      %c0_16 = arith.constant 0 : index
      %23 = vector.load %arg6[%c0_15, %c0_16] : memref<128x128xf32, #tpu.memory_space<vmem>>, vector<128x128xf32>
      tpu.vector_store %arg6[%c0_15, %c0_16], %22 {strides = array<i32>} : memref<128x128xf32, #tpu.memory_space<vmem>>, vector<128x128xf32>,
      %cst_17 = arith.constant 0.000000e+00 : f32
      %24 = vector.broadcast %cst_17 : f32 to vector<128x1xf32>
      %c0_18 = arith.constant 0 : index
      %c0_19 = arith.constant 0 : index
      %25 = vector.load %arg7[%c0_18, %c0_19] : memref<128x1xf32, #tpu.memory_space<vmem>>, vector<128x1xf32>
      tpu.vector_store %arg7[%c0_18, %c0_19], %24 {strides = array<i32>} : memref<128x1xf32, #tpu.memory_space<vmem>>, vector<128x1xf32>,
    } else {
    }
    %c0 = arith.constant 0 : index
    %c0_1 = arith.constant 0 : index
    %3 = vector.load %arg3[%c0, %c0_1] : memref<128x256xi8, #tpu.memory_space<vmem>>, vector<128x256xi8>
    %4 = arith.sitofp %3 : vector<128x256xi8> to vector<128x256xf32>
    %5 = arith.truncf %4 : vector<128x256xf32> to vector<128x256xbf16>
    %c256_i32 = arith.constant 256 : i32
    %6 = arith.muli %arg2, %c256_i32 : i32
    %7 = tpu.assume_multiple %6, 256 : i32
    %8 = arith.index_cast %7 : i32 to index
    %c0_2 = arith.constant 0 : index
    %9 = vector.load %arg4[%8, %c0_2] : memref<256x128xbf16, #tpu.memory_space<vmem>>, vector<256x128xbf16>
    %c0_3 = arith.constant 0 : index
    %c0_4 = arith.constant 0 : index
    %10 = vector.load %arg6[%c0_3, %c0_4] : memref<128x128xf32, #tpu.memory_space<vmem>>, vector<128x128xf32>
    %cst = arith.constant dense<0.000000e+00> : vector<128x128xf32>
    %11 = tpu.matmul %5, %9, %cst {dimension_numbers = #tpu.dot_dimension_numbers<[1], [0], [0], [1], [0, 0, 1, 1], [], []>} : vector<128x256xbf16>, vector<256x128xbf16>, vector<128x128xf32> -> vector<128x128xf32>
    %12 = arith.addf %10, %11 : vector<128x128xf32>
    %c0_5 = arith.constant 0 : index
    %c0_6 = arith.constant 0 : index
    %13 = vector.load %arg6[%c0_5, %c0_6] : memref<128x128xf32, #tpu.memory_space<vmem>>, vector<128x128xf32>
    tpu.vector_store %arg6[%c0_5, %c0_6], %12 {strides = array<i32>} : memref<128x128xf32, #tpu.memory_space<vmem>>, vector<128x128xf32>,
    %c0_7 = arith.constant 0 : index
    %c0_8 = arith.constant 0 : index
    %14 = vector.load %arg7[%c0_7, %c0_8] : memref<128x1xf32, #tpu.memory_space<vmem>>, vector<128x1xf32>
    %cst_9 = arith.constant dense<0.000000e+00> : vector<128xf32>
    %15 = vector.multi_reduction <add>, %4, %cst_9 [1] : vector<128x256xf32> to vector<128xf32>
    %16 = vector.shape_cast %15 : vector<128xf32> to vector<128x1xf32>
    %17 = arith.addf %14, %16 : vector<128x1xf32>
    %c0_10 = arith.constant 0 : index
    %c0_11 = arith.constant 0 : index
    %18 = vector.load %arg7[%c0_10, %c0_11] : memref<128x1xf32, #tpu.memory_space<vmem>>, vector<128x1xf32>
    tpu.vector_store %arg7[%c0_10, %c0_11], %17 {strides = array<i32>} : memref<128x1xf32, #tpu.memory_space<vmem>>, vector<128x1xf32>,
    %c0_i32_12 = arith.constant 0 : i32
    %19 = arith.cmpi eq, %arg2, %c0_i32_12 : i32
    %20 = arith.extui %19 : i1 to i32
    %c0_i32_13 = arith.constant 0 : i32
    %21 = arith.cmpi ne, %20, %c0_i32_13 : i32
    scf.if %21 {
      %c0_14 = arith.constant 0 : index
      %c0_15 = arith.constant 0 : index
      %22 = vector.load %arg7[%c0_14, %c0_15] : memref<128x1xf32, #tpu.memory_space<vmem>>, vector<128x1xf32>
      %cst_16 = arith.constant 1.000000e+00 : f32
      %23 = vector.broadcast %cst_16 : f32 to vector<128x1xf32>
      %24 = arith.maximumf %22, %23 : vector<128x1xf32>
      %25 = math.rsqrt %24 : vector<128x1xf32>
      %c0_17 = arith.constant 0 : index
      %c0_18 = arith.constant 0 : index
      %26 = vector.load %arg6[%c0_17, %c0_18] : memref<128x128xf32, #tpu.memory_space<vmem>>, vector<128x128xf32>
      %27 = vector.broadcast %25 : vector<128x1xf32> to vector<128x128xf32>
      %28 = arith.mulf %26, %27 : vector<128x128xf32>
      %c0_19 = arith.constant 0 : index
      %c0_20 = arith.constant 0 : index
      %29 = vector.load %arg5[%c0_19, %c0_20] : memref<1x128xf32, #tpu.memory_space<vmem>>, vector<1x128xf32>
      %30 = vector.broadcast %29 : vector<1x128xf32> to vector<128x128xf32>
      %31 = arith.addf %28, %30 : vector<128x128xf32>
      %cst_21 = arith.constant 0.000000e+00 : f32
      %32 = vector.broadcast %cst_21 : f32 to vector<128x128xf32>
      %33 = arith.maximumf %31, %32 : vector<128x128xf32>
      %c0_22 = arith.constant 0 : index
      %c0_23 = arith.constant 0 : index
      %34 = vector.load %arg6[%c0_22, %c0_23] : memref<128x128xf32, #tpu.memory_space<vmem>>, vector<128x128xf32>
      tpu.vector_store %arg6[%c0_22, %c0_23], %33 {strides = array<i32>} : memref<128x128xf32, #tpu.memory_space<vmem>>, vector<128x128xf32>,
    } else {
    }
    return
  }
  func.func @transform_0(%arg0: i32, %arg1: i32, %arg2: i32) -> (i32, i32) {
    %c0_i32 = arith.constant 0 : i32
    return %arg0, %arg2 : i32, i32
  }
  func.func @transform_1(%arg0: i32, %arg1: i32, %arg2: i32) -> (i32, i32) {
    %c0_i32 = arith.constant 0 : i32
    %c0_i32_0 = arith.constant 0 : i32
    %c0_i32_1 = arith.constant 0 : i32
    return %c0_i32, %c0_i32_0 : i32, i32
  }
  func.func @transform_2(%arg0: i32, %arg1: i32, %arg2: i32) -> (i32, i32) {
    %c0_i32 = arith.constant 0 : i32
    %c0_i32_0 = arith.constant 0 : i32
    return %c0_i32, %arg1 : i32, i32
  }
  func.func @transform_3(%arg0: i32, %arg1: i32, %arg2: i32) -> (i32, i32) {
    %c0_i32 = arith.constant 0 : i32
    return %arg0, %arg1 : i32, i32
  }
}

</mosaic_0001>

<bundles_post_ra>
// kernel: gcn_block_forward.1
= control target key start
LH: loop header
LB: loop body
LE: loop exit
PB: predicated region body
PF: predicated region fallthrough
CT: control target
= control target key end

     0   :  { %s1284_s12 = smov 0   ;;  %s1286_s13 = smov 0   ;;  %s1529_s0 = inlined_call_operand.vmem [shape: s8[256,256], index: 0, kind: input, shape index: {}]   ;;  %s1530_s1 = inlined_call_operand.vmem [shape: bf16[256,128], index: 1, kind: input, shape index: {}]   ;;  %s1531_s2 = inlined_call_operand.vmem [shape: f32[1,128], index: 2, kind: input, shape index: {}]   ;;  %s1532_s3 = inlined_call_operand.vmem [shape: f32[256,128], index: 3, kind: output, shape index: {}]  }
   0x1   :  { %s1288_s14 = smov 0  }
   0x2 LB: > { %s32_s15 = sadd.s32 1, %s1256_s13  ;;  %p1056_p0 = scmp.ge.s32.totalorder %s1260_s14, 1  ;;  %s1260_s14 = sphi %s1288_s14, %s13_s14   ;;  %s1256_s13 = sphi %s1286_s13, %s1534_s13   ;;  %s1252_s12 = sphi %s1284_s12, %s1533_s12  }
   0x3   : > { %p34_p1 = scmp.ge.s32.totalorder %s32_s15, 2  ;;  %p175_p2 = scmp.lt.s32.totalorder %s1260_s14, 3 }
   0x5   : > { %s1536_s15 = smov (%p34_p1, %s32_s15), 0  ;;  %p176_p3 = pnand %p1056_p0, %p175_p2 }
   0x6   : > { %s1057_s16 = sshll.u32 (!%p176_p3), %s1252_s12, 2  ;;  %v1190_v0 = vld [vmem:[%s1530_s1 + $0x40] sm:$0xff] (!%p176_p3)   ;;  %v1192_v2 = vld [vmem:[%s1530_s1 + $0x48] sm:$0xff] (!%p176_p3)   ;;  %v1194_v4 = vld [vmem:[%s1530_s1 + $0x50] sm:$0xff] (!%p176_p3)   ;;  %vm255_vm0 = vcmask (!%p176_p3), 7168   ;;  %v1262_v5 = vmov (!%p176_p3), 0.0  }
   0x7   : > { %179 = sbr.rel (%p176_p3) target bundleno = 368 (0x170), region = 32  ;;  %p212_p4 = scmp.lt.s32.totalorder (!%p176_p3), %s1057_s16, 7  ;;  %v1191_v1 = vld [vmem:[%s1530_s1] sm:$0xff] (!%p176_p3)   ;;  %1082 = vmatprep.subr.bf16.mxu0 (!%p176_p3), %v1190_v0  ;;  %1146 = vmatprep.subr.bf16.mxu1 (!%p176_p3), %v1190_v0  ;;  %v1193_v3 = vld [vmem:[%s1530_s1 + $0x8] sm:$0xff] (!%p176_p3)   ;;  %258 = vst.msk [vmem:[#allocation2 + $0x10] sm:$0xff] (!%p176_p3), %vm255_vm0, %v1262_v5  ;;  %256 = vst.msk [vmem:[#allocation2] sm:$0xff] (!%p176_p3), %vm255_vm0, %v1262_v5 }
   0x8   : > { %1083 = vmatpush3.bf16.msra.mxu0 (!%p176_p3), %v1191_v1  ;;  %1154 = vmatpush3.bf16.msra.mxu1 (!%p176_p3), %v1191_v1  ;;  %257 = vst.msk [vmem:[#allocation2 + $0x8] sm:$0xff] (!%p176_p3), %vm255_vm0, %v1262_v5  ;;  %259 = vst.msk [vmem:[#allocation2 + $0x18] sm:$0xff] (!%p176_p3), %vm255_vm0, %v1262_v5  ;;  %v1195_v8 = vld [vmem:[%s1530_s1 + $0x10] sm:$0xff] (!%p176_p3)   ;;  %v1196_v13 = vld [vmem:[%s1530_s1 + $0x58] sm:$0xff] (!%p176_p3)  }
   0x9   : > { %1084 = vmatprep.subr.bf16.mxu0 (!%p176_p3), %v1192_v2  ;;  %1147 = vmatprep.subr.bf16.mxu1 (!%p176_p3), %v1192_v2  ;;  %260 = vst.msk [vmem:[#allocation2 + $0x20] sm:$0xff] (!%p176_p3), %vm255_vm0, %v1262_v5  ;;  %261 = vst.msk [vmem:[#allocation2 + $0x28] sm:$0xff] (!%p176_p3), %vm255_vm0, %v1262_v5  ;;  %v1197_v29 = vld [vmem:[%s1530_s1 + $0x18] sm:$0xff] (!%p176_p3)   ;;  %v1198_v34 = vld [vmem:[%s1530_s1 + $0x60] sm:$0xff] (!%p176_p3)  }
   0xa   : > { %262 = vst.msk [vmem:[#allocation2 + $0x30] sm:$0xff] (!%p176_p3), %vm255_vm0, %v1262_v5  ;;  %263 = vst.msk [vmem:[#allocation2 + $0x38] sm:$0xff] (!%p176_p3), %vm255_vm0, %v1262_v5  ;;  %v1199_v44 = vld [vmem:[%s1530_s1 + $0x20] sm:$0xff] (!%p176_p3)   ;;  %v1200_v47 = vld [vmem:[%s1530_s1 + $0x68] sm:$0xff] (!%p176_p3)  }
   0xb   : > { %264 = vst.msk [vmem:[#allocation2 + $0x40] sm:$0xff] (!%p176_p3), %vm255_vm0, %v1262_v5  ;;  %265 = vst.msk [vmem:[#allocation2 + $0x48] sm:$0xff] (!%p176_p3), %vm255_vm0, %v1262_v5  ;;  %v1201_v56 = vld [vmem:[%s1530_s1 + $0x28] sm:$0xff] (!%p176_p3)   ;;  %v1202_v60 = vld [vmem:[%s1530_s1 + $0x70] sm:$0xff] (!%p176_p3)  }
   0xc   : > { %266 = vst.msk [vmem:[#allocation2 + $0x50] sm:$0xff] (!%p176_p3), %vm255_vm0, %v1262_v5  ;;  %267 = vst.msk [vmem:[#allocation2 + $0x58] sm:$0xff] (!%p176_p3), %vm255_vm0, %v1262_v5  ;;  %1085 = vmatpush3.bf16.msra.mxu0 (!%p176_p3), %v1193_v3  ;;  %1155 = vmatpush3.bf16.msra.mxu1 (!%p176_p3), %v1193_v3 }
   0xd   : > { %268 = vst.msk [vmem:[#allocation2 + $0x60] sm:$0xff] (!%p176_p3), %vm255_vm0, %v1262_v5  ;;  %269 = vst.msk [vmem:[#allocation2 + $0x68] sm:$0xff] (!%p176_p3), %vm255_vm0, %v1262_v5  ;;  %1086 = vmatprep.subr.bf16.mxu0 (!%p176_p3), %v1194_v4  ;;  %1148 = vmatprep.subr.bf16.mxu1 (!%p176_p3), %v1194_v4 }
   0xe   : > { %s1538_s16 = smov (!%p212_p4, %s1057_s16), 7  ;;  %270 = vst.msk [vmem:[#allocation2 + $0x70] sm:$0xff] %vm255_vm0, %v1262_v5  ;;  %271 = vst.msk [vmem:[#allocation2 + $0x78] sm:$0xff] %vm255_vm0, %v1262_v5 }
   0xf   : > { %s1081_s27 = sshll.u32 %s1538_s16, 4 }
  0x10   : > { %s1339_s30 = scalar_lea.vmem %s1529_s0, %s1081_s27  ;;  %1087 = vmatpush3.bf16.msra.mxu0 %v1195_v8  ;;  %1156 = vmatpush3.bf16.msra.mxu1 %v1195_v8 }
  0x11   : > { %v1342_v6 = vld [vmem:[%s1339_s30] sm:$0xff]  ;;  %v1345_v7 = vld [vmem:[%s1339_s30 + $0x8] sm:$0xff]  ;;  %v1362_v18 = vld [vmem:[%s1339_s30 + $0x10] sm:$0xff]  ;;  %1088 = vmatprep.subr.bf16.mxu0 %v1196_v13  ;;  %1149 = vmatprep.subr.bf16.mxu1 %v1196_v13 }
  0x12   : > { %v284_v9 = vunpack.c.2.s8 %v1342_v6  ;;  %v285_v10 = vunpack.c.2.s8 %v1345_v7  ;;  %v280_v11 = vunpack.c.0.s8 %v1342_v6  ;;  %v281_v12 = vunpack.c.0.s8 %v1345_v7  ;;  %v1365_v19 = vld [vmem:[%s1339_s30 + $0x18] sm:$0xff]  ;;  %v1368_v28 = vld [vmem:[%s1339_s30 + $0x20] sm:$0xff]  ;;  %v1379_v37 = vld [vmem:[%s1339_s30 + $0x28] sm:$0xff] }
  0x13   : > { %v286_v14 = vunpack.c.3.s8 %v1342_v6  ;;  %v287_v15 = vunpack.c.3.s8 %v1345_v7  ;;  %v282_v16 = vunpack.c.1.s8 %v1342_v6  ;;  %v283_v17 = vunpack.c.1.s8 %v1345_v7  ;;  %v1404_v62 = vld [vmem:[%s1339_s30 + $0x30] sm:$0xff]  ;;  %v1407_v63 = vld [vmem:[%s1339_s30 + $0x38] sm:$0xff]  ;;  %s1060_s30 = sshll.u32 %s1252_s12, 4 }
  0x14   : > { %v316_v20 = vcvt.s32.f32 %v284_v9  ;;  %v317_v21 = vcvt.s32.f32 %v285_v10  ;;  %v312_v22 = vcvt.s32.f32 %v280_v11  ;;  %v313_v23 = vcvt.s32.f32 %v281_v12  ;;  %1089 = vmatpush3.bf16.msra.mxu0 %v1197_v29  ;;  %1157 = vmatpush3.bf16.msra.mxu1 %v1197_v29  ;;  %v1203_v11 = vld [vmem:[%s1530_s1 + $0x30] sm:$0xff]   ;;  %p226_p5 = scmp.lt.s32.totalorder %s1060_s30, 31 }
  0x15   : > { %v318_v24 = vcvt.s32.f32 %v286_v14  ;;  %v319_v25 = vcvt.s32.f32 %v287_v15  ;;  %v314_v26 = vcvt.s32.f32 %v282_v16  ;;  %v315_v27 = vcvt.s32.f32 %v283_v17  ;;  %1090 = vmatprep.subr.bf16.mxu0 %v1198_v34  ;;  %1150 = vmatprep.subr.bf16.mxu1 %v1198_v34  ;;  %v1204_v16 = vld [vmem:[%s1530_s1 + $0x78] sm:$0xff]  }
  0x16   : > { %v660_v30 = vadd.f32 %v317_v21, %v316_v20  ;;  %v654_v31 = vadd.f32 %v313_v23, %v312_v22  ;;  %v290_v32 = vunpack.c.1.s8 %v1362_v18  ;;  %v291_v33 = vunpack.c.1.s8 %v1365_v19  ;;  %s1540_s30 = smov (!%p226_p5, %s1060_s30), 31 }
  0x17   : > { %v663_v35 = vadd.f32 %v319_v25, %v318_v24  ;;  %v657_v36 = vadd.f32 %v315_v27, %v314_v26  ;;  %v294_v40 = vunpack.c.3.s8 %v1362_v18  ;;  %v295_v41 = vunpack.c.3.s8 %v1365_v19  ;;  %v1205_v27 = vld [vmem:[%s1530_s1 + $0x38] sm:$0xff]   ;;  %s1061_s6 = sshll.u32 %s1540_s30, 3 }
  0x18   : > { %661 = vadd.xlane.f32.xlu1 %v660_v30  ;;  %655 = vadd.xlane.f32.xlu0 %v654_v31  ;;  %v322_v38 = vcvt.s32.f32 %v290_v32  ;;  %v323_v39 = vcvt.s32.f32 %v291_v33  ;;  %v288_v42 = vunpack.c.0.s8 %v1362_v18  ;;  %v289_v43 = vunpack.c.0.s8 %v1365_v19  ;;  %s1482_s9 = scalar_lea.vmem %s1532_s3, %s1061_s6 }
  0x19   : > { %v298_v45 = vunpack.c.1.s8 %v1368_v28  ;;  %v299_v46 = vunpack.c.1.s8 %v1379_v37  ;;  %v326_v51 = vcvt.s32.f32 %v294_v40  ;;  %v327_v52 = vcvt.s32.f32 %v295_v41  ;;  %1091 = vmatpush3.bf16.msra.mxu0 %v1199_v44  ;;  %1158 = vmatpush3.bf16.msra.mxu1 %v1199_v44 }
  0x1a   : > { %v320_v48 = vcvt.s32.f32 %v288_v42  ;;  %v321_v49 = vcvt.s32.f32 %v289_v43  ;;  %v669_v50 = vadd.f32 %v323_v39, %v322_v38  ;;  %v292_v54 = vunpack.c.2.s8 %v1362_v18  ;;  %1092 = vmatprep.subr.bf16.mxu0 %v1200_v47  ;;  %1151 = vmatprep.subr.bf16.mxu1 %v1200_v47 }
  0x1b   : > { %v293_v55 = vunpack.c.2.s8 %v1365_v19  ;;  %v330_v57 = vcvt.s32.f32 %v298_v45  ;;  %v331_v58 = vcvt.s32.f32 %v299_v46  ;;  %v302_v59 = vunpack.c.3.s8 %v1368_v28 }
  0x1c   : > { %664 = vadd.xlane.f32.xlu1 %v663_v35  ;;  %658 = vadd.xlane.f32.xlu0 %v657_v36  ;;  %v666_v53 = vadd.f32 %v321_v49, %v320_v48  ;;  %v303_v61 = vunpack.c.3.s8 %v1379_v37  ;;  %v324_v0 = vcvt.s32.f32 %v292_v54  ;;  %v296_v2 = vunpack.c.0.s8 %v1368_v28 }
  0x1d   : > { %v325_v1 = vcvt.s32.f32 %v293_v55  ;;  %v675_v3 = vadd.f32 %v327_v52, %v326_v51  ;;  %v297_v4 = vunpack.c.0.s8 %v1379_v37  ;;  %v300_v9 = vunpack.c.2.s8 %v1368_v28  ;;  %1093 = vmatpush3.bf16.msra.mxu0 %v1201_v56  ;;  %1159 = vmatpush3.bf16.msra.mxu1 %v1201_v56 }
  0x1e   : > { %v328_v8 = vcvt.s32.f32 %v296_v2  ;;  %v301_v10 = vunpack.c.2.s8 %v1379_v37  ;;  %v681_v12 = vadd.f32 %v331_v58, %v330_v57  ;;  %v306_v13 = vunpack.c.1.s8 %v1404_v62  ;;  %1094 = vmatprep.subr.bf16.mxu0 %v1202_v60  ;;  %1152 = vmatprep.subr.bf16.mxu1 %v1202_v60  ;;  %v640_v60 = vld [vmem:[#allocation2 + $0x10] sm:$0xff] }
  0x1f   : > { %v672_v5 = vadd.f32 %v325_v1, %v324_v0  ;;  %v307_v14 = vunpack.c.1.s8 %v1407_v63  ;;  %v329_v15 = vcvt.s32.f32 %v297_v4  ;;  %v334_v17 = vcvt.s32.f32 %v302_v59 }
  0x20   : > { %670 = vadd.xlane.f32.xlu1 %v669_v50  ;;  %667 = vadd.xlane.f32.xlu0 %v666_v53  ;;  %v335_v20 = vcvt.s32.f32 %v303_v61  ;;  %v304_v21 = vunpack.c.0.s8 %v1404_v62  ;;  %v305_v22 = vunpack.c.0.s8 %v1407_v63  ;;  %v332_v24 = vcvt.s32.f32 %v300_v9  ;;  %v638_v61 = vld [vmem:[#allocation2] sm:$0xff]  ;;  %v643_v9 = vld [vmem:[#allocation2 + $0x28] sm:$0xff] }
  0x21   : > { %v678_v23 = vadd.f32 %v329_v15, %v328_v8  ;;  %v333_v25 = vcvt.s32.f32 %v301_v10  ;;  %v345_v26 = vunpack.c.l.s8.bf16 %v1345_v7  ;;  %1095 = vmatpush3.bf16.msra.mxu0 %v1203_v11  ;;  %1160 = vmatpush3.bf16.msra.mxu1 %v1203_v11  ;;  %v338_v29 = vcvt.s32.f32 %v306_v13 }
  0x22   : > { %v339_v30 = vcvt.s32.f32 %v307_v14  ;;  %1096 = vmatprep.subr.bf16.mxu0 %v1204_v16  ;;  %1153 = vmatprep.subr.bf16.mxu1 %v1204_v16  ;;  %v353_v31 = vunpack.c.l.s8.bf16 %v1379_v37  ;;  %v687_v32 = vadd.f32 %v335_v20, %v334_v17  ;;  %v310_v33 = vunpack.c.3.s8 %v1404_v62  ;;  %v645_v14 = vld [vmem:[#allocation2 + $0x38] sm:$0xff]  ;;  %v644_v16 = vld [vmem:[#allocation2 + $0x30] sm:$0xff] }
  0x23   : > { %v311_v34 = vunpack.c.3.s8 %v1407_v63  ;;  %v308_v35 = vunpack.c.2.s8 %v1404_v62  ;;  %541 = vmatprep.mubr.bf16.mxu0 %v345_v26  ;;  %v684_v36 = vadd.f32 %v333_v25, %v332_v24  ;;  %v336_v38 = vcvt.s32.f32 %v304_v21  ;;  %v647_v25 = vld [vmem:[#allocation2 + $0x48] sm:$0xff] }
  0x24   : > { %676 = vadd.xlane.f32.xlu1 %v675_v3  ;;  %673 = vadd.xlane.f32.xlu0 %v672_v5  ;;  %v337_v39 = vcvt.s32.f32 %v305_v22  ;;  %v309_v40 = vunpack.c.2.s8 %v1407_v63  ;;  %v344_v41 = vunpack.c.l.s8.bf16 %v1342_v6  ;;  %v352_v42 = vunpack.c.l.s8.bf16 %v1368_v28  ;;  %v639_v3 = vld [vmem:[#allocation2 + $0x8] sm:$0xff] }
  0x25   : > { %1097 = vmatpush3.bf16.msra.mxu0 %v1205_v27  ;;  %1161 = vmatpush3.bf16.msra.mxu1 %v1205_v27  ;;  %v347_v43 = vunpack.c.h.s8.bf16 %v1345_v7  ;;  %v355_v44 = vunpack.c.h.s8.bf16 %v1379_v37  ;;  %v693_v45 = vadd.f32 %v339_v30, %v338_v29  ;;  %v342_v46 = vcvt.s32.f32 %v310_v33  ;;  %v646_v27 = vld [vmem:[#allocation2 + $0x40] sm:$0xff] }
  0x26   : > { %573 = vmatprep.mubr.bf16.mxu1 %v353_v31  ;;  %v343_v47 = vcvt.s32.f32 %v311_v34  ;;  %v690_v48 = vadd.f32 %v337_v39, %v336_v38  ;;  %v340_v49 = vcvt.s32.f32 %v308_v35  ;;  %v341_v50 = vcvt.s32.f32 %v309_v40  ;;  %v648_v38 = vld [vmem:[#allocation2 + $0x50] sm:$0xff] }
  0x27   : > { %v346_v7 = vunpack.c.h.s8.bf16 %v1342_v6  ;;  %v354_v37 = vunpack.c.h.s8.bf16 %v1368_v28  ;;  %v349_v53 = vunpack.c.l.s8.bf16 %v1365_v19  ;;  %v357_v54 = vunpack.c.l.s8.bf16 %v1407_v63 }
  0x28   : > { %682 = vadd.xlane.f32.xlu1 %v681_v12  ;;  %679 = vadd.xlane.f32.xlu0 %v678_v23  ;;  %v699_v51 = vadd.f32 %v343_v47, %v342_v46  ;;  %v696_v52 = vadd.f32 %v341_v50, %v340_v49  ;;  %v348_v55 = vunpack.c.l.s8.bf16 %v1362_v18  ;;  %v356_v56 = vunpack.c.l.s8.bf16 %v1404_v62  ;;  %v650_v46 = vld [vmem:[#allocation2 + $0x60] sm:$0xff] }
  0x29   : > { %542 = vmatmul.mubr.bf16.vlgmr.msra.gmra.mrb[0].mxu0 %v344_v41  ;;  %574 = vmatmul.mubr.bf16.vlgmr.msra.gmra.mrb[0].mxu1 %v352_v42  ;;  %v351_v57 = vunpack.c.h.s8.bf16 %v1365_v19  ;;  %v359_v6 = vunpack.c.h.s8.bf16 %v1407_v63  ;;  %v1263_v58 = vmov 0   ;;  %v350_v28 = vunpack.c.h.s8.bf16 %v1362_v18  ;;  %v641_v63 = vld [vmem:[#allocation2 + $0x18] sm:$0xff] }
  0x2a   : > { %549 = vmatprep.mubr.bf16.mxu0 %v347_v43  ;;  %581 = vmatprep.mubr.bf16.mxu1 %v355_v44  ;;  %v358_v59 = vunpack.c.h.s8.bf16 %v1404_v62  ;;  %v642_v62 = vld [vmem:[#allocation2 + $0x20] sm:$0xff] }
  0x2b   : > { %1188 = vset.pattern.permute.xlu0 %v1263_v58  ;;  %1189 = vset.pattern.permute.xlu1 %v1263_v58 }
  0x2c   : > { %688 = vadd.xlane.f32.xlu1 %v687_v32  ;;  %685 = vadd.xlane.f32.xlu0 %v684_v36  ;;  %v649_v36 = vld [vmem:[#allocation2 + $0x58] sm:$0xff] }
  0x30   : > { %694 = vadd.xlane.f32.xlu1 %v693_v45  ;;  %691 = vadd.xlane.f32.xlu0 %v690_v48  ;;  %v651_v45 = vld [vmem:[#allocation2 + $0x68] sm:$0xff] }
  0x31   : > { %550 = vmatmul.mubr.bf16.gmra.mrb[4].mxu0 %v346_v7  ;;  %582 = vmatmul.mubr.bf16.gmra.mrb[4].mxu1 %v354_v37  ;;  %v653_v37 = vld [vmem:[#allocation2 + $0x78] sm:$0xff] }
  0x32   : > { %557 = vmatprep.mubr.bf16.mxu0 %v349_v53  ;;  %589 = vmatprep.mubr.bf16.mxu1 %v357_v54  ;;  %v652_v54 = vld [vmem:[#allocation2 + $0x70] sm:$0xff] }
  0x34   : > { %700 = vadd.xlane.f32.xlu1 %v699_v51  ;;  %697 = vadd.xlane.f32.xlu0 %v696_v52 }
  0x39   : > { %558 = vmatmul.mubr.bf16.gmra.mrb[8].mxu0 %v348_v55  ;;  %590 = vmatmul.mubr.bf16.gmra.mrb[8].mxu1 %v356_v56 }
  0x3a   : > { %565 = vmatprep.mubr.bf16.mxu0 %v351_v57  ;;  %597 = vmatprep.mubr.bf16.mxu1 %v359_v6 }
  0x41   : > { %566 = vmatmul.mubr.bf16.gmra.mrb[12].mxu0 %v350_v28  ;;  %598 = vmatmul.mubr.bf16.gmra.mrb[12].mxu1 %v358_v59 }
  0xa5   : > { %v662_v0 = vpop.xlane.xlu1 %661  ;;  %v656_v1 = vpop.xlane.xlu0 %655 }
  0xa6   : > { %v704_v19 = vadd.f32 %v662_v0, %v640_v60  ;;  %v702_v2 = vadd.f32 %v656_v1, %v638_v61 }
  0xa8   : > { %721 = vst.msk [vmem:[#allocation2 + $0x10] sm:$0xff] %vm255_vm0, %v704_v19  ;;  %719 = vst.msk [vmem:[#allocation2] sm:$0xff] %vm255_vm0, %v702_v2 }
  0xa9   : > { %v665_v4 = vpop.xlane.xlu1 %664  ;;  %v659_v5 = vpop.xlane.xlu0 %658 }
  0xaa   : > { %v705_v8 = vadd.f32 %v665_v4, %v641_v63  ;;  %v703_v18 = vadd.f32 %v659_v5, %v639_v3 }
  0xac   : > { %722 = vst.msk [vmem:[#allocation2 + $0x18] sm:$0xff] %vm255_vm0, %v705_v8  ;;  %720 = vst.msk [vmem:[#allocation2 + $0x8] sm:$0xff] %vm255_vm0, %v703_v18 }
  0xad   : > { %v671_v10 = vpop.xlane.xlu1 %670  ;;  %v668_v11 = vpop.xlane.xlu0 %667 }
  0xae   : > { %v707_v12 = vadd.f32 %v671_v10, %v643_v9  ;;  %v706_v13 = vadd.f32 %v668_v11, %v642_v62 }
  0xaf   : > { %v738_v15 = vld [vmem:[#allocation2] sm:$0xff]  ;;  %v740_v22 = vld [vmem:[#allocation2 + $0x10] sm:$0xff] }
  0xb0   : > { %724 = vst.msk [vmem:[#allocation2 + $0x28] sm:$0xff] %vm255_vm0, %v707_v12  ;;  %723 = vst.msk [vmem:[#allocation2 + $0x20] sm:$0xff] %vm255_vm0, %v706_v13  ;;  %v754_v17 = vmax.f32 %v738_v15, 1.0  ;;  %v756_v30 = vmax.f32 %v740_v22, 1.0 }
  0xb1   : > { %v677_v20 = vpop.xlane.xlu1 %676  ;;  %v674_v21 = vpop.xlane.xlu0 %673 }
  0xb2   : > { %v709_v23 = vadd.f32 %v677_v20, %v645_v14  ;;  %1206 = vrsqrt.f32 %v754_v17  ;;  %v708_v24 = vadd.f32 %v674_v21, %v644_v16 }
  0xb3   : > { %v739_v26 = vld [vmem:[#allocation2 + $0x8] sm:$0xff]  ;;  %v741_v33 = vld [vmem:[#allocation2 + $0x18] sm:$0xff] }
  0xb4   : > { %726 = vst.msk [vmem:[#allocation2 + $0x38] sm:$0xff] %vm255_vm0, %v709_v23  ;;  %725 = vst.msk [vmem:[#allocation2 + $0x30] sm:$0xff] %vm255_vm0, %v708_v24  ;;  %v755_v29 = vmax.f32 %v739_v26, 1.0  ;;  %v757_v39 = vmax.f32 %v741_v33, 1.0 }
  0xb5   : > { %v683_v31 = vpop.xlane.xlu1 %682  ;;  %v680_v32 = vpop.xlane.xlu0 %679 }
  0xb6   : > { %v711_v34 = vadd.f32 %v683_v31, %v647_v25  ;;  %1208 = vrsqrt.f32 %v755_v29  ;;  %v710_v35 = vadd.f32 %v680_v32, %v646_v27 }
  0xb7   : > { %1210 = vrsqrt.f32 %v756_v30  ;;  %v742_v42 = vld [vmem:[#allocation2 + $0x20] sm:$0xff]  ;;  %v743_v51 = vld [vmem:[#allocation2 + $0x28] sm:$0xff] }
  0xb8   : > { %728 = vst.msk [vmem:[#allocation2 + $0x48] sm:$0xff] %vm255_vm0, %v711_v34  ;;  %727 = vst.msk [vmem:[#allocation2 + $0x40] sm:$0xff] %vm255_vm0, %v710_v35  ;;  %1212 = vrsqrt.f32 %v757_v39  ;;  %v758_v48 = vmax.f32 %v742_v42, 1.0  ;;  %v759_v57 = vmax.f32 %v743_v51, 1.0 }
  0xb9   : > { %v689_v40 = vpop.xlane.xlu1 %688  ;;  %v686_v41 = vpop.xlane.xlu0 %685 }
  0xba   : > { %v713_v43 = vadd.f32 %v689_v40, %v649_v36  ;;  %v712_v44 = vadd.f32 %v686_v41, %v648_v38  ;;  %1214 = vrsqrt.f32 %v758_v48 }
  0xbb   : > { %v744_v28 = vld [vmem:[#allocation2 + $0x30] sm:$0xff]  ;;  %v745_v2 = vld [vmem:[#allocation2 + $0x38] sm:$0xff] }
  0xbc   : > { %v1207_v47 = vpop.eup %1206  ;;  %730 = vst.msk [vmem:[#allocation2 + $0x58] sm:$0xff] %vm255_vm0, %v713_v43  ;;  %729 = vst.msk [vmem:[#allocation2 + $0x50] sm:$0xff] %vm255_vm0, %v712_v44  ;;  %v760_v19 = vmax.f32 %v744_v28, 1.0  ;;  %v761_v5 = vmax.f32 %v745_v2, 1.0 }
  0xbd   : > { %v695_v49 = vpop.xlane.xlu1 %694  ;;  %804 = vperm.xlu0 %1188, %v1207_v47   ;;  %v692_v50 = vpop.xlane.xlu0 %691 }
  0xbe   : > { %v715_v52 = vadd.f32 %v695_v49, %v651_v45  ;;  %v714_v7 = vadd.f32 %v692_v50, %v650_v46 }
  0xbf   : > { %v747_v53 = vld [vmem:[#allocation2 + $0x48] sm:$0xff]  ;;  %v746_v8 = vld [vmem:[#allocation2 + $0x40] sm:$0xff] }
  0xc0   : > { %v1209_v55 = vpop.eup %1208  ;;  %732 = vst.msk [vmem:[#allocation2 + $0x68] sm:$0xff] %vm255_vm0, %v715_v52  ;;  %v763_v56 = vmax.f32 %v747_v53, 1.0  ;;  %731 = vst.msk [vmem:[#allocation2 + $0x60] sm:$0xff] %vm255_vm0, %v714_v7  ;;  %v762_v11 = vmax.f32 %v746_v8, 1.0 }
  0xc1   : > { %v701_v6 = vpop.xlane.xlu1 %700  ;;  %809 = vperm.xlu1 %1189, %v1209_v55   ;;  %v698_v58 = vpop.xlane.xlu0 %697 }
  0xc2   : > { %v1211_v59 = vpop.eup %1210  ;;  %v717_v60 = vadd.f32 %v701_v6, %v653_v37  ;;  %1216 = vrsqrt.f32 %v763_v56  ;;  %v716_v61 = vadd.f32 %v698_v58, %v652_v54 }
  0xc3   : > { %v749_v0 = vld [vmem:[#allocation2 + $0x58] sm:$0xff]  ;;  %1218 = vrsqrt.f32 %v759_v57  ;;  %v1213_v63 = vpop.eup %1212  ;;  %v748_v12 = vld [vmem:[#allocation2 + $0x50] sm:$0xff] }
  0xc4   : > { %734 = vst.msk [vmem:[#allocation2 + $0x78] sm:$0xff] %vm255_vm0, %v717_v60  ;;  %v765_v1 = vmax.f32 %v749_v0, 1.0  ;;  %733 = vst.msk [vmem:[#allocation2 + $0x70] sm:$0xff] %vm255_vm0, %v716_v61  ;;  %v1215_v18 = vpop.eup %1214  ;;  %v764_v15 = vmax.f32 %v748_v12, 1.0  ;;  %v1476_v12 = vld [vmem:[%s1531_s2] ss:$0 sm:$0xff] }
  0xc5   : > { %814 = vperm.xlu1 %1189, %v1211_v59  }
  0xc6   : > { %1220 = vrsqrt.f32 %v765_v1 }
  0xc7   : > { %v751_v3 = vld [vmem:[#allocation2 + $0x68] sm:$0xff]  ;;  %1222 = vrsqrt.f32 %v760_v19  ;;  %v750_v16 = vld [vmem:[#allocation2 + $0x60] sm:$0xff] }
  0xc8   : > { %v767_v4 = vmax.f32 %v751_v3, 1.0  ;;  %v766_v21 = vmax.f32 %v750_v16, 1.0 }
  0xc9   : > { %819 = vperm.xlu1 %1189, %v1213_v63  }
  0xca   : > { %1224 = vrsqrt.f32 %v767_v4 }
  0xcb   : > { %v753_v9 = vld [vmem:[#allocation2 + $0x78] sm:$0xff]  ;;  %1226 = vrsqrt.f32 %v761_v5  ;;  %v752_v22 = vld [vmem:[#allocation2 + $0x70] sm:$0xff] }
  0xcc   : > { %v1217_v62 = vpop.eup %1216  ;;  %v769_v10 = vmax.f32 %v753_v9, 1.0  ;;  %v768_v25 = vmax.f32 %v752_v22, 1.0 }
  0xcd   : > { %849 = vperm.xlu0 %1188, %v1217_v62   ;;  %824 = vperm.xlu1 %1189, %v1215_v18   ;;  %v1219_v13 = vpop.eup %1218 }
  0xce   : > { %1228 = vrsqrt.f32 %v769_v10 }
  0xcf   : > { %1230 = vrsqrt.f32 %v762_v11 }
  0xd0   : > { %v1221_v14 = vpop.eup %1220  ;;  %1232 = vrsqrt.f32 %v764_v15 }
  0xd1   : > { %859 = vperm.xlu0 %1188, %v1221_v14   ;;  %829 = vperm.xlu1 %1189, %v1219_v13   ;;  %v1223_v17 = vpop.eup %1222  ;;  %1234 = vrsqrt.f32 %v766_v21 }
  0xd2   : > { %1236 = vrsqrt.f32 %v768_v25 }
  0xd4   : > { %v1225_v20 = vpop.eup %1224 }
  0xd5   : > { %869 = vperm.xlu0 %1188, %v1225_v20   ;;  %834 = vperm.xlu1 %1189, %v1223_v17   ;;  %v1227_v23 = vpop.eup %1226 }
  0xd8   : > { %v1229_v24 = vpop.eup %1228 }
  0xd9   : > { %879 = vperm.xlu0 %1188, %v1229_v24   ;;  %839 = vperm.xlu1 %1189, %v1227_v23   ;;  %v1231_v26 = vpop.eup %1230 }
  0xda   : > { %v1233_v27 = vpop.eup %1232 }
  0xdb   : > { %v1235_v29 = vpop.eup %1234 }
  0xdc   : > { %v1237_v30 = vpop.eup %1236 }
  0xdd   : > { %844 = vperm.xlu1 %1189, %v1231_v26  }
  0xe1   : > { %854 = vperm.xlu1 %1189, %v1233_v27  }
  0xe5   : > { %864 = vperm.xlu1 %1189, %v1235_v29  }
  0xe9   : > { %874 = vperm.xlu1 %1189, %v1237_v30  }
  0xfc   : > { %v1098_v31 = vpop.f32.mrb[0].mxu0  ;;  %v1122_v32 = vpop.f32.mrb[0].mxu1 }
  0xfd   : > { %v1099_v33 = vpop.f32.mrb[1].mxu0  ;;  %v1123_v34 = vpop.f32.mrb[1].mxu1 }
  0xfe   : > { %v1100_v35 = vadd.f32 %v1099_v33, %v1098_v31  ;;  %v1101_v36 = vpop.f32.mrb[2].mxu0  ;;  %v1462_v38 = vadd.f32 %v1123_v34, %v1122_v32  ;;  %v1125_v39 = vpop.f32.mrb[2].mxu1 }
  0xff   : > { %v1102_v40 = vpop.f32.mrb[3].mxu0  ;;  %v1126_v41 = vpop.f32.mrb[3].mxu1 }
 0x100   : > { %v1103_v42 = vadd.f32 %v1102_v40, %v1101_v36  ;;  %v1464_v43 = vadd.f32 %v1126_v41, %v1125_v39 }
 0x104   : > { %v1104_v44 = vpop.f32.mrb[4].mxu0  ;;  %v1128_v45 = vpop.f32.mrb[4].mxu1 }
 0x105   : > { %v1105_v46 = vpop.f32.mrb[5].mxu0  ;;  %v1129_v47 = vpop.f32.mrb[5].mxu1 }
 0x106   : > { %v1106_v48 = vadd.f32 %v1105_v46, %v1104_v44  ;;  %v1107_v49 = vpop.f32.mrb[6].mxu0  ;;  %v1466_v50 = vadd.f32 %v1129_v47, %v1128_v45  ;;  %v1131_v51 = vpop.f32.mrb[6].mxu1 }
 0x107   : > { %v1108_v52 = vpop.f32.mrb[7].mxu0  ;;  %v1132_v7 = vpop.f32.mrb[7].mxu1 }
 0x108   : > { %v1109_v37 = vadd.f32 %v1108_v52, %v1107_v49  ;;  %v1133_v53 = vadd.f32 %v1132_v7, %v1131_v51 }
 0x10c   : > { %v1110_v54 = vpop.f32.mrb[8].mxu0  ;;  %v1134_v55 = vpop.f32.mrb[8].mxu1 }
 0x10d   : > { %v1111_v56 = vpop.f32.mrb[9].mxu0  ;;  %v1135_v57 = vpop.f32.mrb[9].mxu1 }
 0x10e   : > { %v1112_v6 = vadd.f32 %v1111_v56, %v1110_v54  ;;  %v1113_v58 = vpop.f32.mrb[10].mxu0  ;;  %v1468_v28 = vadd.f32 %v1135_v57, %v1134_v55  ;;  %v1137_v59 = vpop.f32.mrb[10].mxu1 }
 0x10f   : > { %v1114_v60 = vpop.f32.mrb[11].mxu0  ;;  %v1138_v61 = vpop.f32.mrb[11].mxu1 }
 0x110   : > { %v1115_v0 = vadd.f32 %v1114_v60, %v1113_v58  ;;  %v1139_v1 = vadd.f32 %v1138_v61, %v1137_v59 }
 0x114   : > { %v1116_v19 = vpop.f32.mrb[12].mxu0  ;;  %v1140_v2 = vpop.f32.mrb[12].mxu1 }
 0x115   : > { %v1117_v63 = vpop.f32.mrb[13].mxu0  ;;  %v1141_v3 = vpop.f32.mrb[13].mxu1 }
 0x116   : > { %v1118_v4 = vadd.f32 %v1117_v63, %v1116_v19  ;;  %v1470_v5 = vadd.f32 %v1141_v3, %v1140_v2  ;;  %v1119_v8 = vpop.f32.mrb[14].mxu0  ;;  %v1143_v18 = vpop.f32.mrb[14].mxu1 }
 0x117   : > { %v1120_v9 = vpop.f32.mrb[15].mxu0  ;;  %v1144_v62 = vpop.f32.mrb[15].mxu1 }
 0x118   : > { %v1121_v10 = vadd.f32 %v1120_v9, %v1119_v8  ;;  %v1145_v11 = vadd.f32 %v1144_v62, %v1143_v18 }
 0x13c   : > { %v805_v13 = vpop.permute.xlu0 %804 }
 0x13d   : > { %v882_v14 = vmul.f32 %v1100_v35, %v805_v13 }
 0x13f   : > { %v905_v15 = vadd.f32 %v1476_v12, %v882_v14 }
 0x140   : > { %v810_v16 = vpop.permute.xlu1 %809 }
 0x141   : > { %v921_v17 = vmax.f32 %v905_v15, 0.0  ;;  %v883_v20 = vmul.f32 %v1103_v42, %v810_v16 }
 0x143   : > { %937 = vst [vmem:[%s1482_s9] sm:$0xff] %v921_v17  ;;  %v906_v21 = vadd.f32 %v1476_v12, %v883_v20 }
 0x144   : > { %v815_v22 = vpop.permute.xlu1 %814 }
 0x145   : > { %v922_v23 = vmax.f32 %v906_v21, 0.0  ;;  %v884_v24 = vmul.f32 %v1106_v48, %v815_v22 }
 0x147   : > { %938 = vst [vmem:[%s1482_s9 + $0x8] sm:$0xff] %v922_v23  ;;  %v907_v25 = vadd.f32 %v1476_v12, %v884_v24 }
 0x148   : > { %v820_v26 = vpop.permute.xlu1 %819 }
 0x149   : > { %v923_v27 = vmax.f32 %v907_v25, 0.0  ;;  %v885_v29 = vmul.f32 %v1109_v37, %v820_v26 }
 0x14b   : > { %939 = vst [vmem:[%s1482_s9 + $0x10] sm:$0xff] %v923_v27  ;;  %v908_v30 = vadd.f32 %v1476_v12, %v885_v29 }
 0x14c   : > { %v825_v31 = vpop.permute.xlu1 %824  ;;  %v850_v32 = vpop.permute.xlu0 %849 }
 0x14d   : > { %v924_v33 = vmax.f32 %v908_v30, 0.0  ;;  %v886_v34 = vmul.f32 %v1112_v6, %v825_v31  ;;  %v891_v35 = vmul.f32 %v1464_v43, %v850_v32 }
 0x14f   : > { %940 = vst [vmem:[%s1482_s9 + $0x18] sm:$0xff] %v924_v33  ;;  %v909_v36 = vadd.f32 %v1476_v12, %v886_v34  ;;  %v914_v39 = vadd.f32 %v1476_v12, %v891_v35 }
 0x150   : > { %v830_v40 = vpop.permute.xlu1 %829  ;;  %v860_v41 = vpop.permute.xlu0 %859 }
 0x151   : > { %v925_v42 = vmax.f32 %v909_v36, 0.0  ;;  %v930_v44 = vmax.f32 %v914_v39, 0.0  ;;  %v887_v45 = vmul.f32 %v1115_v0, %v830_v40  ;;  %v893_v46 = vmul.f32 %v1133_v53, %v860_v41 }
 0x153   : > { %941 = vst [vmem:[%s1482_s9 + $0x20] sm:$0xff] %v925_v42  ;;  %946 = vst [vmem:[%s1482_s9 + $0x48] sm:$0xff] %v930_v44  ;;  %v910_v47 = vadd.f32 %v1476_v12, %v887_v45  ;;  %v916_v48 = vadd.f32 %v1476_v12, %v893_v46 }
 0x154   : > { %v835_v43 = vpop.permute.xlu1 %834  ;;  %v870_v49 = vpop.permute.xlu0 %869 }
 0x155   : > { %v926_v51 = vmax.f32 %v910_v47, 0.0  ;;  %v932_v52 = vmax.f32 %v916_v48, 0.0  ;;  %v888_v7 = vmul.f32 %v1118_v4, %v835_v43  ;;  %v895_v37 = vmul.f32 %v1139_v1, %v870_v49 }
 0x157   : > { %942 = vst [vmem:[%s1482_s9 + $0x28] sm:$0xff] %v926_v51  ;;  %948 = vst [vmem:[%s1482_s9 + $0x58] sm:$0xff] %v932_v52  ;;  %v911_v54 = vadd.f32 %v1476_v12, %v888_v7  ;;  %v918_v53 = vadd.f32 %v1476_v12, %v895_v37 }
 0x158   : > { %v840_v55 = vpop.permute.xlu1 %839  ;;  %v880_v56 = vpop.permute.xlu0 %879 }
 0x159   : > { %v927_v57 = vmax.f32 %v911_v54, 0.0  ;;  %v934_v6 = vmax.f32 %v918_v53, 0.0  ;;  %v889_v58 = vmul.f32 %v1121_v10, %v840_v55  ;;  %v897_v59 = vmul.f32 %v1145_v11, %v880_v56 }
 0x15b   : > { %943 = vst [vmem:[%s1482_s9 + $0x30] sm:$0xff] %v927_v57  ;;  %950 = vst [vmem:[%s1482_s9 + $0x68] sm:$0xff] %v934_v6  ;;  %v912_v60 = vadd.f32 %v1476_v12, %v889_v58  ;;  %v920_v61 = vadd.f32 %v1476_v12, %v897_v59 }
 0x15c   : > { %v845_v0 = vpop.permute.xlu1 %844 }
 0x15d   : > { %v928_v1 = vmax.f32 %v912_v60, 0.0  ;;  %v936_v19 = vmax.f32 %v920_v61, 0.0  ;;  %v890_v2 = vmul.f32 %v1462_v38, %v845_v0 }
 0x15f   : > { %944 = vst [vmem:[%s1482_s9 + $0x38] sm:$0xff] %v928_v1  ;;  %952 = vst [vmem:[%s1482_s9 + $0x78] sm:$0xff] %v936_v19  ;;  %v913_v63 = vadd.f32 %v1476_v12, %v890_v2 }
 0x160   : > { %v855_v3 = vpop.permute.xlu1 %854 }
 0x161   : > { %v929_v4 = vmax.f32 %v913_v63, 0.0  ;;  %v892_v8 = vmul.f32 %v1466_v50, %v855_v3 }
 0x163   : > { %945 = vst [vmem:[%s1482_s9 + $0x40] sm:$0xff] %v929_v4  ;;  %v915_v18 = vadd.f32 %v1476_v12, %v892_v8 }
 0x164   : > { %v865_v9 = vpop.permute.xlu1 %864 }
 0x165   : > { %v931_v62 = vmax.f32 %v915_v18, 0.0  ;;  %v894_v10 = vmul.f32 %v1468_v28, %v865_v9 }
 0x167   : > { %947 = vst [vmem:[%s1482_s9 + $0x50] sm:$0xff] %v931_v62  ;;  %v917_v38 = vadd.f32 %v1476_v12, %v894_v10 }
 0x168   : > { %v875_v11 = vpop.permute.xlu1 %874 }
 0x169   : > { %v933_v13 = vmax.f32 %v917_v38, 0.0  ;;  %v896_v14 = vmul.f32 %v1470_v5, %v875_v11 }
 0x16b   : > { %949 = vst [vmem:[%s1482_s9 + $0x60] sm:$0xff] %v933_v13  ;;  %v919_v15 = vadd.f32 %v1476_v12, %v896_v14 }
 0x16d   : > { %v935_v16 = vmax.f32 %v919_v15, 0.0 }
 0x16f   : > { %951 = vst [vmem:[%s1482_s9 + $0x70] sm:$0xff] %v935_v16 }
 0x170 PF: > { %s13_s14 = sadd.s32 1, %s1260_s14   ;;  %s1533_s12 = smov %s1256_s13 }
 0x171   : > { %p10_p6 = scmp.ge.s32.totalorder %s13_s14, 4   ;;  %s1534_s13 = smov %s1536_s15 }
 0x173   :  { %12 = sbr.rel (!%p10_p6) target bundleno = 2 (0x2), region = 74 }

</bundles_post_ra>
